<compile_context>
chip_gen: v7x
topology: tpu7x:2x2x1
jax: 0.10.0
libtpu: 0.0.40
codegen_flags: <defaults>
</compile_context>

<pallas_src>
import functools

import numpy as np
import jax
import jax.numpy as jnp
from jax.experimental import pallas as pl
from jax.experimental.pallas import tpu as pltpu

_SQRT3 = 1.7320508075688772
_ROWS, _LANES = 8, 128          # one f32 vreg tile
_NUM_ITERS = 5                  # fixed-point iterations of line.recompute()


def _network_optimizer_kernel(p_ref, cphi_ref, r_ref, msfx_ref, mpfx_ref, out_ref,
                              *, v_nominal):
    """Iterative radial-feeder voltage-drop solve + percent-drop epilogue."""
    p = p_ref[...]          # (8,128) active power [W]    per phase-row / load-lane
    cphi = cphi_ref[...]    # (8,128) power factor        (padding holds 1.0)
    r = r_ref[...]          # (8,128) segment resistance  [Ohm]
    m_suffix = msfx_ref[...]  # (128,128) lower-triangular mask (suffix sum over loads)
    m_prefix = mpfx_ref[...]  # (128,128) upper-triangular mask (prefix sum over loads)

    # Loop-invariant algebra hoisted out of the fixed-point body (computed once).
    p_over = p / (_SQRT3 * cphi)     # -> i_load = p_over / v
    r_scaled = _SQRT3 * r            # -> du contribution = i_seg * r_scaled

    v = jnp.full_like(p, v_nominal)

    # Static unroll: trip count is a fixed small constant; lets the scheduler
    # interleave MXU pushes / EUP reciprocals / VPU muls across iterations.
    for _ in range(_NUM_ITERS):
        # load current at each node (depends on node voltage -> fixed point);
        # TODO(synk): approx reciprocal has ~1e-3 rel. error; verified acceptable
        # for a percent-drop output after 5 iterations.
        i_load = p_over * pl.reciprocal(v, approx=True)
        # segment current = sum of all downstream load currents (suffix sum, MXU)
        i_seg = jnp.dot(i_load, m_suffix, preferred_element_type=jnp.float32)
        # cumulative line-to-line voltage drop up to each node (prefix sum, MXU)
        du = jnp.dot(i_seg * r_scaled, m_prefix, preferred_element_type=jnp.float32)
        v = v_nominal - du           # residual voltage at each node

    # voltage_drop_percent = (1 - dux / v_nominal) * 100
    out_ref[...] = (1.0 - v / v_nominal) * 100.0


@functools.partial(jax.jit, static_argnames=("v_nominal",))
def network_optimizer_forward(resistivity, active_power, power_factor, positions,
                              v_nominal):
    """Pallas-backed equivalent of NetworkOptimizer.forward().

    Args:
      resistivity:  (N, 3) f32, ohm/km per line segment per phase (the nn.Parameter).
      active_power: (N, 3) f32, W drawn by each load per phase.
      power_factor: (N,)   f32, cos(phi) of each load.
      positions:    (N,)   f32, km position of each load along the feeder (increasing).
      v_nominal:    scalar (static), nominal line voltage.

    Returns:
      (N, 3) f32 voltage drop percentage at each load / phase.
    """
    n = resistivity.shape[0]
    if n > _LANES:
        # TODO(synk): >128 loads needs a multi-lane-block variant with blocked
        # triangular matmuls; refuse rather than silently truncate.
        raise ValueError(f"network_optimizer_forward supports at most {_LANES} loads, got {n}")

    # ---- layout glue (fused under the same jit as the pallas_call) ----------
    pos = positions.astype(jnp.float32)
    dx = jnp.diff(jnp.concatenate([jnp.zeros((1,), jnp.float32), pos]))   # segment lengths (km)
    r_seg = (resistivity.astype(jnp.float32) * dx[:, None]).T             # (3, N) ohm
    p = active_power.astype(jnp.float32).T                                # (3, N) W
    cphi = jnp.broadcast_to(power_factor.astype(jnp.float32)[None, :], (3, n))

    def pad(x, fill):
        buf = jnp.full((_ROWS, _LANES), fill, jnp.float32)
        return buf.at[: x.shape[0], : x.shape[1]].set(x)

    p_pad = pad(p, 0.0)
    cphi_pad = pad(cphi, 1.0)   # 1.0 padding keeps the hoisted division well-defined
    r_pad = pad(r_seg, 0.0)

    # Triangular suffix/prefix masks, precomputed as constants (depend only on n).
    j = np.arange(_LANES)[:, None]
    k = np.arange(_LANES)[None, :]
    valid = (j < n) & (k < n)
    m_suffix = jnp.asarray(((j >= k) & valid).astype(np.float32))   # (128,128)
    m_prefix = jnp.asarray(((j <= k) & valid).astype(np.float32))   # (128,128)

    kernel = functools.partial(_network_optimizer_kernel, v_nominal=float(v_nominal))

    vmem = pltpu.MemorySpace.VMEM
    out = pl.pallas_call(
        kernel,
        out_shape=jax.ShapeDtypeStruct((_ROWS, _LANES), jnp.float32),
        in_specs=[pl.BlockSpec(memory_space=vmem) for _ in range(5)],
        out_specs=pl.BlockSpec(memory_space=vmem),
    )(p_pad, cphi_pad, r_pad, m_suffix, m_prefix)

    return out[:3, :n].T        # (N, 3) voltage_drop_percent


if __name__ == "__main__":
    N_LOADS = 8
    V_NOMINAL = 400.0

    key = jax.random.PRNGKey(0)
    k_res, k_pow, k_pos = jax.random.split(key, 3)

    # Deterministic synthetic "line" (replaces line.get_resistivity_tensor() / load dicts).
    resistivity = 0.10 + 0.10 * jax.random.uniform(k_res, (N_LOADS, 3), jnp.float32)
    active_power = 1000.0 + 4000.0 * jax.random.uniform(k_pow, (N_LOADS, 3), jnp.float32)
    power_factor = jnp.full((N_LOADS,), 0.9, jnp.float32)
    positions = jnp.cumsum(
        0.10 + 0.05 * jax.random.uniform(k_pos, (N_LOADS,), jnp.float32)
    )  # km, strictly increasing

    vdp = network_optimizer_forward(
        resistivity, active_power, power_factor, positions, V_NOMINAL
    )
    jax.block_until_ready(vdp)

    assert vdp.shape == (N_LOADS, 3)
    assert bool(jnp.all(jnp.isfinite(vdp)))
    # Drops must be non-negative and monotonically non-decreasing along the feeder.
    assert bool(jnp.all(vdp >= -1e-4))
    assert bool(jnp.all(jnp.diff(vdp, axis=0) >= -1e-4))
    print("KERNEL_OK")
</pallas_src>

<mosaic_0001>
module attributes {stable_mosaic.version = 11 : i64} {
  func.func @_network_optimizer_kernel(%arg0: memref<8x128xf32, #tpu.memory_space<vmem>>, %arg1: memref<8x128xf32, #tpu.memory_space<vmem>>, %arg2: memref<8x128xf32, #tpu.memory_space<vmem>>, %arg3: memref<128x128xf32, #tpu.memory_space<vmem>>, %arg4: memref<128x128xf32, #tpu.memory_space<vmem>>, %arg5: memref<8x128xf32, #tpu.memory_space<vmem>>) attributes {dimension_semantics = [], scalar_prefetch = 0 : i64, scratch_operands = 0 : i64, tpu.core_type = #tpu.core_type<tc>} {
    %c0 = arith.constant 0 : index
    %c0_0 = arith.constant 0 : index
    %0 = vector.load %arg0[%c0, %c0_0] : memref<8x128xf32, #tpu.memory_space<vmem>>, vector<8x128xf32>
    %c0_1 = arith.constant 0 : index
    %c0_2 = arith.constant 0 : index
    %1 = vector.load %arg1[%c0_1, %c0_2] : memref<8x128xf32, #tpu.memory_space<vmem>>, vector<8x128xf32>
    %c0_3 = arith.constant 0 : index
    %c0_4 = arith.constant 0 : index
    %2 = vector.load %arg2[%c0_3, %c0_4] : memref<8x128xf32, #tpu.memory_space<vmem>>, vector<8x128xf32>
    %c0_5 = arith.constant 0 : index
    %c0_6 = arith.constant 0 : index
    %3 = vector.load %arg3[%c0_5, %c0_6] : memref<128x128xf32, #tpu.memory_space<vmem>>, vector<128x128xf32>
    %c0_7 = arith.constant 0 : index
    %c0_8 = arith.constant 0 : index
    %4 = vector.load %arg4[%c0_7, %c0_8] : memref<128x128xf32, #tpu.memory_space<vmem>>, vector<128x128xf32>
    %cst = arith.constant 1.73205078 : f32
    %5 = vector.broadcast %cst : f32 to vector<8x128xf32>
    %6 = arith.mulf %5, %1 : vector<8x128xf32>
    %7 = arith.divf %0, %6 : vector<8x128xf32>
    %cst_9 = arith.constant 1.73205078 : f32
    %8 = vector.broadcast %cst_9 : f32 to vector<8x128xf32>
    %9 = arith.mulf %8, %2 : vector<8x128xf32>
    %cst_10 = arith.constant 4.000000e+02 : f32
    %10 = vector.broadcast %cst_10 : f32 to vector<8x128xf32>
    %11 = tpu.reciprocal %10 {approx = true} : vector<8x128xf32> -> vector<8x128xf32>
    %12 = arith.mulf %7, %11 : vector<8x128xf32>
    %cst_11 = arith.constant dense<0.000000e+00> : vector<8x128xf32>
    %13 = tpu.matmul %12, %3, %cst_11 {dimension_numbers = #tpu.dot_dimension_numbers<[1], [0], [0], [1], [0, 0, 1, 1], [], []>} : vector<8x128xf32>, vector<128x128xf32>, vector<8x128xf32> -> vector<8x128xf32>
    %14 = arith.mulf %13, %9 : vector<8x128xf32>
    %cst_12 = arith.constant dense<0.000000e+00> : vector<8x128xf32>
    %15 = tpu.matmul %14, %4, %cst_12 {dimension_numbers = #tpu.dot_dimension_numbers<[1], [0], [0], [1], [0, 0, 1, 1], [], []>} : vector<8x128xf32>, vector<128x128xf32>, vector<8x128xf32> -> vector<8x128xf32>
    %cst_13 = arith.constant 4.000000e+02 : f32
    %16 = vector.broadcast %cst_13 : f32 to vector<8x128xf32>
    %17 = arith.subf %16, %15 : vector<8x128xf32>
    %18 = tpu.reciprocal %17 {approx = true} : vector<8x128xf32> -> vector<8x128xf32>
    %19 = arith.mulf %7, %18 : vector<8x128xf32>
    %cst_14 = arith.constant dense<0.000000e+00> : vector<8x128xf32>
    %20 = tpu.matmul %19, %3, %cst_14 {dimension_numbers = #tpu.dot_dimension_numbers<[1], [0], [0], [1], [0, 0, 1, 1], [], []>} : vector<8x128xf32>, vector<128x128xf32>, vector<8x128xf32> -> vector<8x128xf32>
    %21 = arith.mulf %20, %9 : vector<8x128xf32>
    %cst_15 = arith.constant dense<0.000000e+00> : vector<8x128xf32>
    %22 = tpu.matmul %21, %4, %cst_15 {dimension_numbers = #tpu.dot_dimension_numbers<[1], [0], [0], [1], [0, 0, 1, 1], [], []>} : vector<8x128xf32>, vector<128x128xf32>, vector<8x128xf32> -> vector<8x128xf32>
    %cst_16 = arith.constant 4.000000e+02 : f32
    %23 = vector.broadcast %cst_16 : f32 to vector<8x128xf32>
    %24 = arith.subf %23, %22 : vector<8x128xf32>
    %25 = tpu.reciprocal %24 {approx = true} : vector<8x128xf32> -> vector<8x128xf32>
    %26 = arith.mulf %7, %25 : vector<8x128xf32>
    %cst_17 = arith.constant dense<0.000000e+00> : vector<8x128xf32>
    %27 = tpu.matmul %26, %3, %cst_17 {dimension_numbers = #tpu.dot_dimension_numbers<[1], [0], [0], [1], [0, 0, 1, 1], [], []>} : vector<8x128xf32>, vector<128x128xf32>, vector<8x128xf32> -> vector<8x128xf32>
    %28 = arith.mulf %27, %9 : vector<8x128xf32>
    %cst_18 = arith.constant dense<0.000000e+00> : vector<8x128xf32>
    %29 = tpu.matmul %28, %4, %cst_18 {dimension_numbers = #tpu.dot_dimension_numbers<[1], [0], [0], [1], [0, 0, 1, 1], [], []>} : vector<8x128xf32>, vector<128x128xf32>, vector<8x128xf32> -> vector<8x128xf32>
    %cst_19 = arith.constant 4.000000e+02 : f32
    %30 = vector.broadcast %cst_19 : f32 to vector<8x128xf32>
    %31 = arith.subf %30, %29 : vector<8x128xf32>
    %32 = tpu.reciprocal %31 {approx = true} : vector<8x128xf32> -> vector<8x128xf32>
    %33 = arith.mulf %7, %32 : vector<8x128xf32>
    %cst_20 = arith.constant dense<0.000000e+00> : vector<8x128xf32>
    %34 = tpu.matmul %33, %3, %cst_20 {dimension_numbers = #tpu.dot_dimension_numbers<[1], [0], [0], [1], [0, 0, 1, 1], [], []>} : vector<8x128xf32>, vector<128x128xf32>, vector<8x128xf32> -> vector<8x128xf32>
    %35 = arith.mulf %34, %9 : vector<8x128xf32>
    %cst_21 = arith.constant dense<0.000000e+00> : vector<8x128xf32>
    %36 = tpu.matmul %35, %4, %cst_21 {dimension_numbers = #tpu.dot_dimension_numbers<[1], [0], [0], [1], [0, 0, 1, 1], [], []>} : vector<8x128xf32>, vector<128x128xf32>, vector<8x128xf32> -> vector<8x128xf32>
    %cst_22 = arith.constant 4.000000e+02 : f32
    %37 = vector.broadcast %cst_22 : f32 to vector<8x128xf32>
    %38 = arith.subf %37, %36 : vector<8x128xf32>
    %39 = tpu.reciprocal %38 {approx = true} : vector<8x128xf32> -> vector<8x128xf32>
    %40 = arith.mulf %7, %39 : vector<8x128xf32>
    %cst_23 = arith.constant dense<0.000000e+00> : vector<8x128xf32>
    %41 = tpu.matmul %40, %3, %cst_23 {dimension_numbers = #tpu.dot_dimension_numbers<[1], [0], [0], [1], [0, 0, 1, 1], [], []>} : vector<8x128xf32>, vector<128x128xf32>, vector<8x128xf32> -> vector<8x128xf32>
    %42 = arith.mulf %41, %9 : vector<8x128xf32>
    %cst_24 = arith.constant dense<0.000000e+00> : vector<8x128xf32>
    %43 = tpu.matmul %42, %4, %cst_24 {dimension_numbers = #tpu.dot_dimension_numbers<[1], [0], [0], [1], [0, 0, 1, 1], [], []>} : vector<8x128xf32>, vector<128x128xf32>, vector<8x128xf32> -> vector<8x128xf32>
    %cst_25 = arith.constant 4.000000e+02 : f32
    %44 = vector.broadcast %cst_25 : f32 to vector<8x128xf32>
    %45 = arith.subf %44, %43 : vector<8x128xf32>
    %cst_26 = arith.constant 4.000000e+02 : f32
    %46 = vector.broadcast %cst_26 : f32 to vector<8x128xf32>
    %47 = arith.divf %45, %46 : vector<8x128xf32>
    %cst_27 = arith.constant 1.000000e+00 : f32
    %48 = vector.broadcast %cst_27 : f32 to vector<8x128xf32>
    %49 = arith.subf %48, %47 : vector<8x128xf32>
    %cst_28 = arith.constant 1.000000e+02 : f32
    %50 = vector.broadcast %cst_28 : f32 to vector<8x128xf32>
    %51 = arith.mulf %49, %50 : vector<8x128xf32>
    %c0_29 = arith.constant 0 : index
    %c0_30 = arith.constant 0 : index
    %52 = vector.load %arg5[%c0_29, %c0_30] : memref<8x128xf32, #tpu.memory_space<vmem>>, vector<8x128xf32>
    tpu.vector_store %arg5[%c0_29, %c0_30], %51 {strides = array<i32>} : memref<8x128xf32, #tpu.memory_space<vmem>>, vector<8x128xf32>,
    return
  }
}

</mosaic_0001>

<bundles_post_ra>
// kernel: network_optimizer_forward.1
= control target key start
LH: loop header
LB: loop body
LE: loop exit
PB: predicated region body
PF: predicated region fallthrough
CT: control target
= control target key end

     0   :  { %10 = vsyncpa [#allocation3], 0  ;;  %s1942_s0 = inlined_call_operand.vmem [shape: f32[8,128], index: 0, kind: input, shape index: {}]   ;;  %s1943_s1 = inlined_call_operand.vmem [shape: f32[8,128], index: 1, kind: input, shape index: {}]   ;;  %s1944_s2 = inlined_call_operand.vmem [shape: f32[8,128], index: 2, kind: input, shape index: {}]   ;;  %s1945_s3 = inlined_call_operand.hbm [shape: f32[128,128], index: 3, kind: input, shape index: {}]   ;;  %s1946_s4 = inlined_call_operand.hbm [shape: f32[128,128], index: 4, kind: input, shape index: {}]   ;;  %s1947_s5 = inlined_call_operand.vmem [shape: f32[8,128], index: 5, kind: output, shape index: {}]  }
   0x1   :  { %11 = vsyncpa [#allocation5], 0  ;;  %s1643_s18 = smov [#allocation2]   ;;  %s1595_s22 = scalar_lea.hbm %s1945_s3, 2048 }
   0x2   :  { %s23_s19 = sshll.u32 %s1643_s18, 4  ;;  %p1596_p0 = scmp.ne.s32.totalorder %s1945_s3, %s1595_s22  ;;  %s24_s19 = int_to_ptr.vmem [resolvable:$true] %s23_s19 }
   0x3   :  { %p1599_p1 = scmp.lt.u32.totalorder %s1595_s22, %s1945_s3 }
   0x5   :  { %p1601_p2 = pnand %p1599_p1, %p1596_p0 }
   0x7   :  { %1604 = shalt.err (!%p1601_p2)
}
   0x8   :  { %s1605_s27 = scalar_lea.vmem %s24_s19, 2048  ;;  %p1610_p4 = scmp.lt.s32.totalorder %s24_s19, %s24_s19 }
   0x9   :  { %p1606_p3 = scmp.ne.s32.totalorder %s24_s19, %s1605_s27  ;;  %p1611_p5 = scmp.lt.s32.totalorder %s1605_s27, %s1605_s27 }
   0xb   :  { %p1612_p6 = por %p1611_p5, %p1610_p4 }
   0xd   :  { %p1613_p7 = pnand %p1612_p6, %p1606_p3 }
   0xf   :  { %1616 = shalt.err (!%p1613_p7)
}
  0x10   :  { %s1644_s28 = smov 128   ;;  %s1645_s29 = smov 8  }
  0x11   :  { %29 = dma.hbm_to_vmem [thread:$0]  %s1945_s3, 2048, %s24_s19, [#allocation3], %s1644_s28, %s1644_s28, %s1645_s29  }
  0x12   :  { %s1646_s7 = smov [#allocation4]   ;;  %s1617_s11 = scalar_lea.hbm %s1946_s4, 2048 }
  0x13   :  { %s35_s8 = sshll.u32 %s1646_s7, 4  ;;  %p1618_p8 = scmp.ne.s32.totalorder %s1946_s4, %s1617_s11  ;;  %s36_s8 = int_to_ptr.vmem [resolvable:$true] %s35_s8 }
  0x14   :  { %p1621_p9 = scmp.lt.u32.totalorder %s1617_s11, %s1946_s4 }
  0x16   :  { %p1623_p10 = pnand %p1621_p9, %p1618_p8 }
  0x18   :  { %1626 = shalt.err (!%p1623_p10)
}
  0x19   :  { %s1627_s16 = scalar_lea.vmem %s36_s8, 2048  ;;  %p1632_p12 = scmp.lt.s32.totalorder %s36_s8, %s36_s8 }
  0x1a   :  { %p1628_p11 = scmp.ne.s32.totalorder %s36_s8, %s1627_s16  ;;  %p1633_p13 = scmp.lt.s32.totalorder %s1627_s16, %s1627_s16 }
  0x1c   :  { %p1634_p0 = por %p1633_p13, %p1632_p12 }
  0x1e   :  { %p1635_p1 = pnand %p1634_p0, %p1628_p11 }
  0x20   :  { %1638 = shalt.err (!%p1635_p1)
}
  0x21   :  { %41 = dma.hbm_to_vmem [thread:$0]  %s1946_s4, 2048, %s36_s8, [#allocation5], %s1644_s28, %s1644_s28, %s1645_s29  }
  0x22   :  { %1639 = dma.done.wait [#allocation3], 2048  }
  0x23   :  { %1640 = vsyncadd [#allocation3], 4294965248 }
  0x24   :  { %1641 = dma.done.wait [#allocation5], 2048  }
  0x25   :  { %1642 = vsyncadd [#allocation5], 4294965248  ;;  %v1647_v0 = vmov 0.0|0.0   ;;  %vm1648_vm0 = vmmov 0   ;;  %v1649_v1 = vmov 0.0   ;;  %v51_v2 = vld [vmem:[#allocation2] sm:$0xff] }
  0x26   :  { %1338 = vmatprep.subr.bf16.mxu0 %v1647_v0  ;;  %1020 = vmatprep.mubr.msk.f32.mxu0 %vm1648_vm0, %v1649_v1  ;;  %v52_v3 = vld [vmem:[#allocation2 + $0x8] sm:$0xff]  ;;  %v53_v4 = vld [vmem:[#allocation2 + $0x10] sm:$0xff]  ;;  %v54_v6 = vld [vmem:[#allocation2 + $0x18] sm:$0xff] }
  0x27   :  { %1362 = vmatprep.subr.bf16.mxu1 %v1647_v0  ;;  %1055 = vmatprep.mubr.msk.f32.mxu1 %vm1648_vm0, %v1649_v1  ;;  %v1710_v5 = vpack.c.bf16 %v52_v3, %v51_v2  ;;  %v1713_v7 = vpack.c.bf16 %v54_v6, %v53_v4  ;;  %v55_v8 = vld [vmem:[#allocation2 + $0x20] sm:$0xff]  ;;  %v56_v9 = vld [vmem:[#allocation2 + $0x28] sm:$0xff]  ;;  %v69_v13 = vld [vmem:[#allocation4 + $0x10] sm:$0xff] }
  0x28   :  { %v49_v10 = vld [vmem:[%s1943_s1] sm:$0xff]  ;;  %v68_v12 = vld [vmem:[#allocation4 + $0x8] sm:$0xff]  ;;  %v1720_v14 = vpack.c.bf16 %v56_v9, %v55_v8  ;;  %v70_v16 = vld [vmem:[#allocation4 + $0x18] sm:$0xff] }
  0x29   :  { %1340 = vmatpush3.bf16.msra.mxu0 %v1710_v5  ;;  %v67_v11 = vld [vmem:[#allocation4] sm:$0xff]  ;;  %v57_v17 = vld [vmem:[#allocation2 + $0x30] sm:$0xff]  ;;  %v58_v18 = vld [vmem:[#allocation2 + $0x38] sm:$0xff]  ;;  %v83_v19 = vmul.f32 1.7320508, %v49_v10  ;;  %v1726_v20 = vpack.c.bf16 %v70_v16, %v69_v13 }
  0x2a   :  { %1341 = vmatprep.subr.bf16.mxu0 %v1647_v0  ;;  %v1722_v15 = vpack.c.bf16 %v68_v12, %v67_v11  ;;  %v71_v21 = vld [vmem:[#allocation4 + $0x20] sm:$0xff]  ;;  %v72_v22 = vld [vmem:[#allocation4 + $0x28] sm:$0xff]  ;;  %v1730_v23 = vpack.c.bf16 %v58_v18, %v57_v17  ;;  %v73_v27 = vld [vmem:[#allocation4 + $0x30] sm:$0xff] }
  0x2b   :  { %v59_v24 = vld [vmem:[#allocation2 + $0x40] sm:$0xff]  ;;  %v60_v25 = vld [vmem:[#allocation2 + $0x48] sm:$0xff]  ;;  %1585 = vrcp.f32 %v83_v19  ;;  %v1734_v26 = vpack.c.bf16 %v72_v22, %v71_v21  ;;  %v74_v28 = vld [vmem:[#allocation4 + $0x38] sm:$0xff] }
  0x2c   :  { %1364 = vmatpush3.bf16.msra.mxu1 %v1722_v15  ;;  %v1738_v29 = vpack.c.bf16 %v60_v25, %v59_v24  ;;  %v61_v30 = vld [vmem:[#allocation2 + $0x50] sm:$0xff]  ;;  %v62_v31 = vld [vmem:[#allocation2 + $0x58] sm:$0xff]  ;;  %v1742_v32 = vpack.c.bf16 %v74_v28, %v73_v27  ;;  %v75_v33 = vld [vmem:[#allocation4 + $0x40] sm:$0xff] }
  0x2d   :  { %1343 = vmatpush3.bf16.msra.mxu0 %v1713_v7  ;;  %1365 = vmatprep.subr.bf16.mxu1 %v1647_v0  ;;  %v76_v34 = vld [vmem:[#allocation4 + $0x48] sm:$0xff]  ;;  %v1746_v35 = vpack.c.bf16 %v62_v31, %v61_v30  ;;  %v63_v36 = vld [vmem:[#allocation2 + $0x60] sm:$0xff]  ;;  %v77_v39 = vld [vmem:[#allocation4 + $0x50] sm:$0xff] }
  0x2e   :  { %1344 = vmatprep.subr.bf16.mxu0 %v1647_v0  ;;  %v64_v37 = vld [vmem:[#allocation2 + $0x68] sm:$0xff]  ;;  %v1750_v38 = vpack.c.bf16 %v76_v34, %v75_v33  ;;  %v78_v40 = vld [vmem:[#allocation4 + $0x58] sm:$0xff]  ;;  %v48_v43 = vld [vmem:[%s1942_s0] sm:$0xff] }
  0x2f   :  { %v1754_v42 = vpack.c.bf16 %v64_v37, %v63_v36  ;;  %v65_v44 = vld [vmem:[#allocation2 + $0x70] sm:$0xff]  ;;  %v66_v45 = vld [vmem:[#allocation2 + $0x78] sm:$0xff]  ;;  %v1761_v46 = vpack.c.bf16 %v78_v40, %v77_v39  ;;  %v79_v48 = vld [vmem:[#allocation4 + $0x60] sm:$0xff] }
  0x30   :  { %1367 = vmatpush3.bf16.msra.mxu1 %v1726_v20  ;;  %v80_v49 = vld [vmem:[#allocation4 + $0x68] sm:$0xff]  ;;  %v1767_v50 = vpack.c.bf16 %v66_v45, %v65_v44  ;;  %v81_v53 = vld [vmem:[#allocation4 + $0x70] sm:$0xff]  ;;  %v82_v54 = vld [vmem:[#allocation4 + $0x78] sm:$0xff] }
  0x31   :  { %1346 = vmatpush3.bf16.msra.mxu0 %v1720_v14  ;;  %1368 = vmatprep.subr.bf16.mxu1 %v1647_v0  ;;  %v1771_v51 = vpack.c.bf16 %v80_v49, %v79_v48  ;;  %v1797_v55 = vpack.c.bf16 %v82_v54, %v81_v53  ;;  %v50_v56 = vld [vmem:[%s1944_s2] sm:$0xff] }
  0x32   :  { %1347 = vmatprep.subr.bf16.mxu0 %v1647_v0  ;;  %v1804_v57 = vmul.f32 1.7320508, %v50_v56 }
  0x34   :  { %1370 = vmatpush3.bf16.msra.mxu1 %v1734_v26 }
  0x35   :  { %1349 = vmatpush3.bf16.msra.mxu0 %v1730_v23  ;;  %1371 = vmatprep.subr.bf16.mxu1 %v1647_v0  ;;  %v1586_v41 = vpop.eup %1585 }
  0x36   :  { %1350 = vmatprep.subr.bf16.mxu0 %v1647_v0  ;;  %v1763_v47 = vmul.f32 %v1586_v41, %v48_v43 }
  0x38   :  { %1373 = vmatpush3.bf16.msra.mxu1 %v1742_v32  ;;  %v88_v52 = vmul.f32 0.0025, %v1763_v47 }
  0x39   :  { %1352 = vmatpush3.bf16.msra.mxu0 %v1738_v29  ;;  %1374 = vmatprep.subr.bf16.mxu1 %v1647_v0 }
  0x3a   :  { %1353 = vmatprep.subr.bf16.mxu0 %v1647_v0 }
  0x3c   :  { %1376 = vmatpush3.bf16.msra.mxu1 %v1750_v38 }
  0x3d   :  { %1355 = vmatpush3.bf16.msra.mxu0 %v1746_v35  ;;  %1377 = vmatprep.subr.bf16.mxu1 %v1647_v0 }
  0x3e   :  { %1356 = vmatprep.subr.bf16.mxu0 %v1647_v0 }
  0x40   :  { %1379 = vmatpush3.bf16.msra.mxu1 %v1761_v46 }
  0x41   :  { %1358 = vmatpush3.bf16.msra.mxu0 %v1754_v42  ;;  %1380 = vmatprep.subr.bf16.mxu1 %v1647_v0 }
  0x42   :  { %1359 = vmatprep.subr.bf16.mxu0 %v1647_v0 }
  0x44   :  { %1382 = vmatpush3.bf16.msra.mxu1 %v1771_v51 }
  0x45   :  { %1361 = vmatpush3.bf16.msra.mxu0 %v1767_v50  ;;  %1383 = vmatprep.subr.bf16.mxu1 %v1647_v0 }
  0x46   :  { %1386 = vmatprep.subr.bf16.mxu0 %v1647_v0 }
  0x48   :  { %1021 = vmatmul.mubr.f32.vlgmr.msra.gmra.mrb[0].mxu0 %v88_v52  ;;  %1385 = vmatpush3.bf16.msra.mxu1 %v1797_v55 }
  0x49   :  { %1388 = vmatpush3.bf16.msra.mxu0 %v1710_v5  ;;  %1090 = vmatprep.mubr.msk.f32.mxu0 %vm1648_vm0, %v1649_v1 }
  0x4a   :  { %1389 = vmatprep.subr.bf16.mxu0 %v1647_v0  ;;  %1410 = vmatprep.subr.bf16.mxu1 %v1647_v0 }
  0x4d   :  { %1391 = vmatpush3.bf16.msra.mxu0 %v1713_v7 }
  0x4e   :  { %1392 = vmatprep.subr.bf16.mxu0 %v1647_v0 }
  0x51   :  { %1394 = vmatpush3.bf16.msra.mxu0 %v1720_v14 }
  0x52   :  { %1395 = vmatprep.subr.bf16.mxu0 %v1647_v0 }
  0x55   :  { %1397 = vmatpush3.bf16.msra.mxu0 %v1730_v23 }
  0x56   :  { %1398 = vmatprep.subr.bf16.mxu0 %v1647_v0 }
  0x59   :  { %1400 = vmatpush3.bf16.msra.mxu0 %v1738_v29 }
  0x5a   :  { %1401 = vmatprep.subr.bf16.mxu0 %v1647_v0 }
  0x5d   :  { %1403 = vmatpush3.bf16.msra.mxu0 %v1746_v35 }
  0x5e   :  { %1404 = vmatprep.subr.bf16.mxu0 %v1647_v0 }
  0x61   :  { %1406 = vmatpush3.bf16.msra.mxu0 %v1754_v42 }
  0x62   :  { %1407 = vmatprep.subr.bf16.mxu0 %v1647_v0 }
  0x65   :  { %1409 = vmatpush3.bf16.msra.mxu0 %v1767_v50 }
  0x66   :  { %1434 = vmatprep.subr.bf16.mxu0 %v1647_v0 }
 0x11b   :  { %v155_v58 = vpop.f32.mrb[0].mxu0 }
 0x11c   :  { %v159_v59 = vmul.f32 %v155_v58, %v1804_v57  ;;  %v1022_v60 = vpop.f32.mrb[1].mxu0 }
 0x11e   :  { %1056 = vmatmul.mubr.f32.vlgmr.msra.gmra.mrb[0].mxu1 %v159_v59 }
 0x11f   :  { %1412 = vmatpush3.bf16.msra.mxu1 %v1722_v15  ;;  %1125 = vmatprep.mubr.msk.f32.mxu1 %vm1648_vm0, %v1649_v1 }
 0x120   :  { %1413 = vmatprep.subr.bf16.mxu1 %v1647_v0 }
 0x123   :  { %1415 = vmatpush3.bf16.msra.mxu1 %v1726_v20 }
 0x124   :  { %1416 = vmatprep.subr.bf16.mxu1 %v1647_v0 }
 0x127   :  { %1418 = vmatpush3.bf16.msra.mxu1 %v1734_v26 }
 0x128   :  { %1419 = vmatprep.subr.bf16.mxu1 %v1647_v0 }
 0x12b   :  { %1421 = vmatpush3.bf16.msra.mxu1 %v1742_v32 }
 0x12c   :  { %1422 = vmatprep.subr.bf16.mxu1 %v1647_v0 }
 0x12f   :  { %1424 = vmatpush3.bf16.msra.mxu1 %v1750_v38 }
 0x130   :  { %1425 = vmatprep.subr.bf16.mxu1 %v1647_v0 }
 0x133   :  { %1427 = vmatpush3.bf16.msra.mxu1 %v1761_v46 }
 0x134   :  { %1428 = vmatprep.subr.bf16.mxu1 %v1647_v0 }
 0x137   :  { %1430 = vmatpush3.bf16.msra.mxu1 %v1771_v51 }
 0x138   :  { %1431 = vmatprep.subr.bf16.mxu1 %v1647_v0 }
 0x13b   :  { %1433 = vmatpush3.bf16.msra.mxu1 %v1797_v55 }
 0x13c   :  { %1458 = vmatprep.subr.bf16.mxu1 %v1647_v0 }
 0x1f1   :  { %v226_v61 = vpop.f32.mrb[0].mxu1 }
 0x1f2   :  { %v230_v62 = vsub.f32 400.0, %v226_v61  ;;  %v1057_v63 = vpop.f32.mrb[1].mxu1 }
 0x1f4   :  { %1587 = vrcp.f32 %v230_v62 }
 0x1fe   :  { %v1588_v2 = vpop.eup %1587 }
 0x1ff   :  { %v232_v3 = vmul.f32 %v1588_v2, %v1763_v47 }
 0x201   :  { %1091 = vmatmul.mubr.f32.vlgmr.msra.gmra.mrb[2].mxu0 %v232_v3 }
 0x202   :  { %1436 = vmatpush3.bf16.msra.mxu0 %v1710_v5  ;;  %1160 = vmatprep.mubr.msk.f32.mxu0 %vm1648_vm0, %v1649_v1 }
 0x203   :  { %1437 = vmatprep.subr.bf16.mxu0 %v1647_v0 }
 0x206   :  { %1439 = vmatpush3.bf16.msra.mxu0 %v1713_v7 }
 0x207   :  { %1440 = vmatprep.subr.bf16.mxu0 %v1647_v0 }
 0x20a   :  { %1442 = vmatpush3.bf16.msra.mxu0 %v1720_v14 }
 0x20b   :  { %1443 = vmatprep.subr.bf16.mxu0 %v1647_v0 }
 0x20e   :  { %1445 = vmatpush3.bf16.msra.mxu0 %v1730_v23 }
 0x20f   :  { %1446 = vmatprep.subr.bf16.mxu0 %v1647_v0 }
 0x212   :  { %1448 = vmatpush3.bf16.msra.mxu0 %v1738_v29 }
 0x213   :  { %1449 = vmatprep.subr.bf16.mxu0 %v1647_v0 }
 0x216   :  { %1451 = vmatpush3.bf16.msra.mxu0 %v1746_v35 }
 0x217   :  { %1452 = vmatprep.subr.bf16.mxu0 %v1647_v0 }
 0x21a   :  { %1454 = vmatpush3.bf16.msra.mxu0 %v1754_v42 }
 0x21b   :  { %1455 = vmatprep.subr.bf16.mxu0 %v1647_v0 }
 0x21e   :  { %1457 = vmatpush3.bf16.msra.mxu0 %v1767_v50 }
 0x21f   :  { %1482 = vmatprep.subr.bf16.mxu0 %v1647_v0 }
 0x2d4   :  { %v299_v4 = vpop.f32.mrb[2].mxu0 }
 0x2d5   :  { %v303_v6 = vmul.f32 %v299_v4, %v1804_v57  ;;  %v1092_v8 = vpop.f32.mrb[3].mxu0 }
 0x2d7   :  { %1126 = vmatmul.mubr.f32.vlgmr.msra.gmra.mrb[2].mxu1 %v303_v6 }
 0x2d8   :  { %1460 = vmatpush3.bf16.msra.mxu1 %v1722_v15  ;;  %1195 = vmatprep.mubr.msk.f32.mxu1 %vm1648_vm0, %v1649_v1 }
 0x2d9   :  { %1461 = vmatprep.subr.bf16.mxu1 %v1647_v0 }
 0x2dc   :  { %1463 = vmatpush3.bf16.msra.mxu1 %v1726_v20 }
 0x2dd   :  { %1464 = vmatprep.subr.bf16.mxu1 %v1647_v0 }
 0x2e0   :  { %1466 = vmatpush3.bf16.msra.mxu1 %v1734_v26 }
 0x2e1   :  { %1467 = vmatprep.subr.bf16.mxu1 %v1647_v0 }
 0x2e4   :  { %1469 = vmatpush3.bf16.msra.mxu1 %v1742_v32 }
 0x2e5   :  { %1470 = vmatprep.subr.bf16.mxu1 %v1647_v0 }
 0x2e8   :  { %1472 = vmatpush3.bf16.msra.mxu1 %v1750_v38 }
 0x2e9   :  { %1473 = vmatprep.subr.bf16.mxu1 %v1647_v0 }
 0x2ec   :  { %1475 = vmatpush3.bf16.msra.mxu1 %v1761_v46 }
 0x2ed   :  { %1476 = vmatprep.subr.bf16.mxu1 %v1647_v0 }
 0x2f0   :  { %1478 = vmatpush3.bf16.msra.mxu1 %v1771_v51 }
 0x2f1   :  { %1479 = vmatprep.subr.bf16.mxu1 %v1647_v0 }
 0x2f4   :  { %1481 = vmatpush3.bf16.msra.mxu1 %v1797_v55 }
 0x2f5   :  { %1506 = vmatprep.subr.bf16.mxu1 %v1647_v0 }
 0x3aa   :  { %v370_v9 = vpop.f32.mrb[2].mxu1 }
 0x3ab   :  { %v374_v10 = vsub.f32 400.0, %v370_v9  ;;  %v1127_v11 = vpop.f32.mrb[3].mxu1 }
 0x3ad   :  { %1589 = vrcp.f32 %v374_v10 }
 0x3b7   :  { %v1590_v12 = vpop.eup %1589 }
 0x3b8   :  { %v376_v13 = vmul.f32 %v1590_v12, %v1763_v47 }
 0x3ba   :  { %1161 = vmatmul.mubr.f32.vlgmr.msra.gmra.mrb[4].mxu0 %v376_v13 }
 0x3bb   :  { %1484 = vmatpush3.bf16.msra.mxu0 %v1710_v5  ;;  %1230 = vmatprep.mubr.msk.f32.mxu0 %vm1648_vm0, %v1649_v1 }
 0x3bc   :  { %1485 = vmatprep.subr.bf16.mxu0 %v1647_v0 }
 0x3bf   :  { %1487 = vmatpush3.bf16.msra.mxu0 %v1713_v7 }
 0x3c0   :  { %1488 = vmatprep.subr.bf16.mxu0 %v1647_v0 }
 0x3c3   :  { %1490 = vmatpush3.bf16.msra.mxu0 %v1720_v14 }
 0x3c4   :  { %1491 = vmatprep.subr.bf16.mxu0 %v1647_v0 }
 0x3c7   :  { %1493 = vmatpush3.bf16.msra.mxu0 %v1730_v23 }
 0x3c8   :  { %1494 = vmatprep.subr.bf16.mxu0 %v1647_v0 }
 0x3cb   :  { %1496 = vmatpush3.bf16.msra.mxu0 %v1738_v29 }
 0x3cc   :  { %1497 = vmatprep.subr.bf16.mxu0 %v1647_v0 }
 0x3cf   :  { %1499 = vmatpush3.bf16.msra.mxu0 %v1746_v35 }
 0x3d0   :  { %1500 = vmatprep.subr.bf16.mxu0 %v1647_v0 }
 0x3d3   :  { %1502 = vmatpush3.bf16.msra.mxu0 %v1754_v42 }
 0x3d4   :  { %1503 = vmatprep.subr.bf16.mxu0 %v1647_v0 }
 0x3d7   :  { %1505 = vmatpush3.bf16.msra.mxu0 %v1767_v50 }
 0x3d8   :  { %1530 = vmatprep.subr.bf16.mxu0 %v1647_v0 }
 0x48d   :  { %v443_v16 = vpop.f32.mrb[4].mxu0 }
 0x48e   :  { %v447_v17 = vmul.f32 %v443_v16, %v1804_v57  ;;  %v1162_v18 = vpop.f32.mrb[5].mxu0 }
 0x490   :  { %1196 = vmatmul.mubr.f32.vlgmr.msra.gmra.mrb[4].mxu1 %v447_v17 }
 0x491   :  { %1508 = vmatpush3.bf16.msra.mxu1 %v1722_v15  ;;  %1265 = vmatprep.mubr.msk.f32.mxu1 %vm1648_vm0, %v1649_v1 }
 0x492   :  { %1509 = vmatprep.subr.bf16.mxu1 %v1647_v0 }
 0x495   :  { %1511 = vmatpush3.bf16.msra.mxu1 %v1726_v20 }
 0x496   :  { %1512 = vmatprep.subr.bf16.mxu1 %v1647_v0 }
 0x499   :  { %1514 = vmatpush3.bf16.msra.mxu1 %v1734_v26 }
 0x49a   :  { %1515 = vmatprep.subr.bf16.mxu1 %v1647_v0 }
 0x49d   :  { %1517 = vmatpush3.bf16.msra.mxu1 %v1742_v32 }
 0x49e   :  { %1518 = vmatprep.subr.bf16.mxu1 %v1647_v0 }
 0x4a1   :  { %1520 = vmatpush3.bf16.msra.mxu1 %v1750_v38 }
 0x4a2   :  { %1521 = vmatprep.subr.bf16.mxu1 %v1647_v0 }
 0x4a5   :  { %1523 = vmatpush3.bf16.msra.mxu1 %v1761_v46 }
 0x4a6   :  { %1524 = vmatprep.subr.bf16.mxu1 %v1647_v0 }
 0x4a9   :  { %1526 = vmatpush3.bf16.msra.mxu1 %v1771_v51 }
 0x4aa   :  { %1527 = vmatprep.subr.bf16.mxu1 %v1647_v0 }
 0x4ad   :  { %1529 = vmatpush3.bf16.msra.mxu1 %v1797_v55 }
 0x4ae   :  { %1554 = vmatprep.subr.bf16.mxu1 %v1647_v0 }
 0x563   :  { %v514_v19 = vpop.f32.mrb[4].mxu1 }
 0x564   :  { %v518_v21 = vsub.f32 400.0, %v514_v19  ;;  %v1197_v22 = vpop.f32.mrb[5].mxu1 }
 0x566   :  { %1591 = vrcp.f32 %v518_v21 }
 0x570   :  { %v1592_v24 = vpop.eup %1591 }
 0x571   :  { %v520_v25 = vmul.f32 %v1592_v24, %v1763_v47 }
 0x573   :  { %1231 = vmatmul.mubr.f32.vlgmr.msra.gmra.mrb[6].mxu0 %v520_v25 }
 0x574   :  { %1532 = vmatpush3.bf16.msra.mxu0 %v1710_v5  ;;  %1300 = vmatprep.mubr.msk.f32.mxu0 %vm1648_vm0, %v1649_v1 }
 0x575   :  { %1533 = vmatprep.subr.bf16.mxu0 %v1647_v0 }
 0x578   :  { %1535 = vmatpush3.bf16.msra.mxu0 %v1713_v7 }
 0x579   :  { %1536 = vmatprep.subr.bf16.mxu0 %v1647_v0 }
 0x57c   :  { %1538 = vmatpush3.bf16.msra.mxu0 %v1720_v14 }
 0x57d   :  { %1539 = vmatprep.subr.bf16.mxu0 %v1647_v0 }
 0x580   :  { %1541 = vmatpush3.bf16.msra.mxu0 %v1730_v23 }
 0x581   :  { %1542 = vmatprep.subr.bf16.mxu0 %v1647_v0 }
 0x584   :  { %1544 = vmatpush3.bf16.msra.mxu0 %v1738_v29 }
 0x585   :  { %1545 = vmatprep.subr.bf16.mxu0 %v1647_v0 }
 0x588   :  { %1547 = vmatpush3.bf16.msra.mxu0 %v1746_v35 }
 0x589   :  { %1548 = vmatprep.subr.bf16.mxu0 %v1647_v0 }
 0x58c   :  { %1550 = vmatpush3.bf16.msra.mxu0 %v1754_v42 }
 0x58d   :  { %1551 = vmatprep.subr.bf16.mxu0 %v1647_v0 }
 0x590   :  { %1553 = vmatpush3.bf16.msra.mxu0 %v1767_v50 }
 0x646   :  { %v587_v5 = vpop.f32.mrb[6].mxu0 }
 0x647   :  { %v591_v7 = vmul.f32 %v587_v5, %v1804_v57  ;;  %v1232_v14 = vpop.f32.mrb[7].mxu0 }
 0x649   :  { %1266 = vmatmul.mubr.f32.vlgmr.msra.gmra.mrb[6].mxu1 %v591_v7 }
 0x64a   :  { %1556 = vmatpush3.bf16.msra.mxu1 %v1722_v15  ;;  %1335 = vmatprep.mubr.msk.f32.mxu1 %vm1648_vm0, %v1649_v1 }
 0x64b   :  { %1557 = vmatprep.subr.bf16.mxu1 %v1647_v0 }
 0x64e   :  { %1559 = vmatpush3.bf16.msra.mxu1 %v1726_v20 }
 0x64f   :  { %1560 = vmatprep.subr.bf16.mxu1 %v1647_v0 }
 0x652   :  { %1562 = vmatpush3.bf16.msra.mxu1 %v1734_v26 }
 0x653   :  { %1563 = vmatprep.subr.bf16.mxu1 %v1647_v0 }
 0x656   :  { %1565 = vmatpush3.bf16.msra.mxu1 %v1742_v32 }
 0x657   :  { %1566 = vmatprep.subr.bf16.mxu1 %v1647_v0 }
 0x65a   :  { %1568 = vmatpush3.bf16.msra.mxu1 %v1750_v38 }
 0x65b   :  { %1569 = vmatprep.subr.bf16.mxu1 %v1647_v0 }
 0x65e   :  { %1571 = vmatpush3.bf16.msra.mxu1 %v1761_v46 }
 0x65f   :  { %1572 = vmatprep.subr.bf16.mxu1 %v1647_v0 }
 0x662   :  { %1574 = vmatpush3.bf16.msra.mxu1 %v1771_v51 }
 0x663   :  { %1575 = vmatprep.subr.bf16.mxu1 %v1647_v0 }
 0x666   :  { %1577 = vmatpush3.bf16.msra.mxu1 %v1797_v55 }
 0x71c   :  { %v658_v1 = vpop.f32.mrb[6].mxu1 }
 0x71d   :  { %v662_v15 = vsub.f32 400.0, %v658_v1  ;;  %v1267_v20 = vpop.f32.mrb[7].mxu1 }
 0x71f   :  { %1593 = vrcp.f32 %v662_v15 }
 0x729   :  { %v1594_v23 = vpop.eup %1593 }
 0x72a   :  { %v664_v26 = vmul.f32 %v1594_v23, %v1763_v47 }
 0x72c   :  { %1301 = vmatmul.mubr.f32.vlgmr.msra.gmra.mrb[8].mxu0 %v664_v26 }
 0x7ff   :  { %v731_v27 = vpop.f32.mrb[8].mxu0 }
 0x800   :  { %v735_v28 = vmul.f32 %v731_v27, %v1804_v57  ;;  %v1302_v29 = vpop.f32.mrb[9].mxu0 }
 0x802   :  { %1336 = vmatmul.mubr.f32.vlgmr.msra.gmra.mrb[8].mxu1 %v735_v28 }
 0x8d5   :  { %v802_v30 = vpop.f32.mrb[8].mxu1 }
 0x8d6   :  { %v806_v31 = vsub.f32 400.0, %v802_v30  ;;  %v1337_v32 = vpop.f32.mrb[9].mxu1 }
 0x8d8   :  { %v808_v33 = vmul.f32 0.0025, %v806_v31 }
 0x8da   :  { %v809_v0 = vsub.f32 1.0, %v808_v33 }
 0x8dc   :  { %v810_v34 = vmul.f32 100.0, %v809_v0 }
 0x8de   :  { %811 = vst [vmem:[%s1947_s5] sm:$0xff] %v810_v34 }
 0x8df   :  { %816 = vsyncpa [#allocation3], 1 }
 0x8e0   :  { %817 = vsyncpa [#allocation5], 1 }

</bundles_post_ra>
